<compile_context>
chip_gen: v5e
topology: v5e:2x2
jax: 0.10.0
libtpu: 0.0.40
codegen_flags: <defaults>
</compile_context>

<pallas_src>
import math
from functools import partial

import jax
import jax.numpy as jnp
from jax import lax
from jax.experimental import pallas as pl
from jax.experimental.pallas import tpu as pltpu

# NOTE: exp(_NEG_LARGE - m_new) must underflow to exactly 0.0 in f32 (it does
# for -1e30).  Keep this well inside f32 range if edited.
_NEG_LARGE = -1.0e30


def _round_up(a, b):
    return (a + b - 1) // b * b


# ----------------------------- prepass kernels -------------------------------

def _normalize_rows_kernel(x_ref, o_ref):
    # F.normalize(x, dim=-1): x / max(||x||, 1e-12)   (1e-24 == eps**2).
    x = x_ref[...].astype(jnp.float32)
    ssq = jnp.sum(x * x, axis=-1, keepdims=True)
    o_ref[...] = (x * lax.rsqrt(jnp.maximum(ssq, 1e-24))).astype(o_ref.dtype)


def _normalize_rows_t_kernel(w_ref, o_ref):
    # Normalize rows of w[TC, D] and store transposed as o[D, TC] so the main
    # matmul is a canonical [TM,D]x[D,TC] contraction (lane-dense class axis).
    w = w_ref[...].astype(jnp.float32)
    ssq = jnp.sum(w * w, axis=-1, keepdims=True)
    wn = w * lax.rsqrt(jnp.maximum(ssq, 1e-24))
    o_ref[...] = wn.T.astype(o_ref.dtype)


# ------------------------------- main kernel ---------------------------------

def _arc_margin_kernel(x_ref, w_ref, loss_ref, m_sc, l_sc, zt_sc, *,
                       num, n_rows, n_classes, c_pad, cos_m, sin_m, th, mm, s,
                       easy_margin):
    i = pl.program_id(0)          # row (M) tile   -- "parallel"
    j = pl.program_id(1)          # class (C) tile -- "arbitrary", innermost
    tm = x_ref.shape[0]
    tc = w_ref.shape[1]

    # ---- per-row-tile init of the online-softmax state ----------------------
    @pl.when(j == 0)
    def _():
        m_sc[...] = jnp.full_like(m_sc, _NEG_LARGE)
        l_sc[...] = jnp.zeros_like(l_sc)
        zt_sc[...] = jnp.zeros_like(zt_sc)

    # ---- cosine for this [TM, TC] tile (MXU, f32 accumulation) --------------
    cosine = jnp.dot(x_ref[...], w_ref[...],
                     preferred_element_type=jnp.float32)

    # label[m, c] = 1 iff c == (m % num), from the *global* row index, so row
    # tiles need not align with num.  is_true is built from a (1, TC) lane
    # iota against a (TM, 1) vector — no (TM, TC) int32 tensor.
    row = i * tm + lax.broadcasted_iota(jnp.int32, (tm, 1), 0)       # (TM, 1)
    true_class = row % num                                           # (TM, 1)
    local_true = true_class - j * tc                                 # (TM, 1)
    in_tile = (local_true >= 0) & (local_true < tc)                  # (TM, 1)
    col = lax.broadcasted_iota(jnp.int32, (1, tc), 1)                # (1, TC)
    is_true = col == local_true                                      # (TM, TC)

    # ---- ArcFace margin on the (TM, 1) true-class column only ---------------
    cos_t = jnp.sum(jnp.where(is_true, cosine, 0.0), axis=-1,
                    keepdims=True)                                   # (TM, 1)
    sine_t = jnp.sqrt(jnp.clip(1.0 - cos_t * cos_t, 0.0, 1.0))
    phi_t = cos_t * cos_m - sine_t * sin_m
    if easy_margin:
        phi_t = jnp.where(cos_t > 0.0, phi_t, cos_t)
    else:
        phi_t = jnp.where(cos_t > th, phi_t, cos_t - mm)

    logits = jnp.where(is_true, phi_t, cosine) * s                   # (TM, TC)
    if c_pad > n_classes:
        # Only when C is not lane-aligned: mask padded class columns out of
        # the softmax denominator (only the last class tile carries padding).
        logits = jnp.where(col < (n_classes - j * tc), logits, _NEG_LARGE)

    # True-class logit straight from the (TM, 1) vector (no full-tile reduce).
    zt_sc[...] += jnp.where(in_tile, phi_t * s, 0.0)

    # ---- online log-sum-exp over the class axis ------------------------------
    m_new = jnp.maximum(m_sc[...], jnp.max(logits, axis=-1, keepdims=True))
    l_sc[...] = (l_sc[...] * jnp.exp(m_sc[...] - m_new) +
                 jnp.sum(jnp.exp(logits - m_new), axis=-1, keepdims=True))
    m_sc[...] = m_new

    # ---- finalize: per-row loss = logsumexp(logits) - true_logit ------------
    @pl.when(j == pl.num_programs(1) - 1)
    def _():
        loss = jnp.log(l_sc[...]) + m_sc[...] - zt_sc[...]
        loss_ref[...] = jnp.where(row < n_rows, loss, 0.0)


# --------------------------------- wrapper -----------------------------------

def _pick_tiles(M, C, D_pad, tile_m, tile_c, elem_bytes):
    """Generation-aware row/class tiles plus an explicit VMEM scoped limit."""
    try:
        vmem_cap = int(pltpu.get_tpu_info().vmem_capacity_bytes)
    except Exception:
        vmem_cap = 64 << 20                          # conservative (v7x)
    big_vmem = vmem_cap >= (96 << 20)                # v5e / v6e (128 MiB)
    if tile_m is None:
        # v6e needs ~650 flop/byte to hide weight re-streaming; v7x ~310.
        tile_m = 512 if big_vmem else 384
    if tile_c is None:
        tile_c = 1024
    budget = (64 << 20) if big_vmem else (40 << 20)  # keep <~48 MiB on v7x

    tm = _round_up(min(tile_m, _round_up(M, 8)), 8)
    # Keep >= 2 row tiles when possible so both v7x TensorCores get work.
    if _round_up(M, tm) == tm and M > 8:
        tm = _round_up((tm + 1) // 2, 8)
    tc = _round_up(min(tile_c, _round_up(C, 128)), 128)

    def need(tm_, tc_):   # double-buffered x & w tiles + tiny scratch/out
        return (2 * tm_ * D_pad * elem_bytes
                + 2 * D_pad * tc_ * elem_bytes
                + 5 * tm_ * 4)

    while need(tm, tc) > budget and tc > 128:
        tc = max(128, _round_up(tc // 2, 128))
    while need(tm, tc) > budget and tm > 8:
        tm = max(8, _round_up(tm // 2, 8))

    m_pad = _round_up(M, tm)
    c_pad = _round_up(C, tc)
    cap = (100 << 20) if big_vmem else (56 << 20)
    vmem_limit = int(min(max(need(tm, tc) + (8 << 20), 32 << 20), cap))
    return tm, m_pad, tc, c_pad, vmem_limit


def arc_margin_forward(x, weight, *, s=20.0, m=0.5, easy_margin=False,
                       tile_m=None, tile_c=None, mxu_dtype=jnp.bfloat16):
    """x: [B, num, D] float32, weight: [C, D] float32 (C must equal num)."""
    B, N, D = x.shape
    C = weight.shape[0]
    assert C == N, "out_features must equal num (required by label broadcast)"
    M = B * N

    D_pad = _round_up(D, 128)     # lane-dense K; zero padding is harmless for
                                  # both the normalization sums and the dots.
    elem_bytes = jnp.dtype(mxu_dtype).itemsize
    tm, m_pad, tc, c_pad, vmem_limit = _pick_tiles(
        M, C, D_pad, tile_m, tile_c, elem_bytes)
    nm, nc = m_pad // tm, c_pad // tc

    x2 = x.reshape(M, D).astype(jnp.float32)
    x2 = jnp.pad(x2, ((0, m_pad - M), (0, D_pad - D)))
    w = jnp.pad(weight.astype(jnp.float32), ((0, c_pad - C), (0, D_pad - D)))

    # Prepass 1: normalize x rows once, emit mxu_dtype (halves x HBM traffic).
    x_n = pl.pallas_call(
        _normalize_rows_kernel,
        out_shape=jax.ShapeDtypeStruct((m_pad, D_pad), mxu_dtype),
        grid=(nm,),
        in_specs=[pl.BlockSpec((tm, D_pad), lambda i: (i, 0))],
        out_specs=pl.BlockSpec((tm, D_pad), lambda i: (i, 0)),
        compiler_params=pltpu.CompilerParams(
            dimension_semantics=("parallel",),
            vmem_limit_bytes=vmem_limit),
    )(x2)

    # Prepass 2: normalize the weight once and store it transposed as [D, C].
    w_nt = pl.pallas_call(
        _normalize_rows_t_kernel,
        out_shape=jax.ShapeDtypeStruct((D_pad, c_pad), mxu_dtype),
        grid=(nc,),
        in_specs=[pl.BlockSpec((tc, D_pad), lambda i: (i, 0))],
        out_specs=pl.BlockSpec((D_pad, tc), lambda i: (0, i)),
        compiler_params=pltpu.CompilerParams(
            dimension_semantics=("parallel",),
            vmem_limit_bytes=vmem_limit),
    )(w)

    kernel = partial(
        _arc_margin_kernel,
        num=N, n_rows=M, n_classes=C, c_pad=c_pad,
        cos_m=math.cos(m), sin_m=math.sin(m),
        th=math.cos(math.pi - m), mm=math.sin(math.pi - m) * m,
        s=s, easy_margin=easy_margin,
    )

    per_row_loss = pl.pallas_call(
        kernel,
        out_shape=jax.ShapeDtypeStruct((m_pad, 1), jnp.float32),
        grid=(nm, nc),
        in_specs=[
            pl.BlockSpec((tm, D_pad), lambda i, j: (i, 0)),   # normalized x
            pl.BlockSpec((D_pad, tc), lambda i, j: (0, j)),   # normalized w^T
        ],
        out_specs=pl.BlockSpec((tm, 1), lambda i, j: (i, 0)),
        scratch_shapes=[
            pltpu.VMEM((tm, 1), jnp.float32),   # running max
            pltpu.VMEM((tm, 1), jnp.float32),   # running sum of exp
            pltpu.VMEM((tm, 1), jnp.float32),   # true-class logit
        ],
        compiler_params=pltpu.CompilerParams(
            dimension_semantics=("parallel", "arbitrary"),
            vmem_limit_bytes=vmem_limit),
    )(x_n, w_nt)

    return jnp.sum(per_row_loss) / M


# ------------------------------ pure-JAX reference ---------------------------

def arc_margin_ref(x, weight, *, s=20.0, m=0.5, easy_margin=False):
    """Pure-JAX reference mirroring the PyTorch forward exactly (f32)."""
    B, N, D = x.shape
    cos_m, sin_m = math.cos(m), math.sin(m)
    th, mm = math.cos(math.pi - m), math.sin(math.pi - m) * m
    x_n = x / jnp.maximum(
        jnp.sqrt(jnp.sum(x * x, axis=-1, keepdims=True)), 1e-12)
    w_n = weight / jnp.maximum(
        jnp.sqrt(jnp.sum(weight * weight, axis=-1, keepdims=True)), 1e-12)
    cosine = jnp.einsum("bnd,cd->bnc", x_n, w_n, precision="highest")
    sine = jnp.sqrt(jnp.clip(1.0 - cosine ** 2, 0.0, 1.0))
    phi = cosine * cos_m - sine * sin_m
    if easy_margin:
        phi = jnp.where(cosine > 0.0, phi, cosine)
    else:
        phi = jnp.where(cosine > th, phi, cosine - mm)
    label = jnp.broadcast_to(jnp.eye(N)[None], (B, N, N))
    out = jnp.exp((label * phi + (1.0 - label) * cosine) * s)
    loss = -jnp.log(jnp.sum(label * out, axis=-1) / jnp.sum(out, axis=-1))
    return jnp.mean(loss)


if __name__ == "__main__":
    key = jax.random.PRNGKey(0)
    B, num, in_features = 2, 8, 32
    out_features = num  # required by the module's label broadcasting

    kx, kw = jax.random.split(key)
    x = jax.random.normal(kx, (B, num, in_features), dtype=jnp.float32)
    # xavier_uniform_ on an (out_features, in_features) weight
    bound = math.sqrt(6.0 / (in_features + out_features))
    weight = jax.random.uniform(
        kw, (out_features, in_features), dtype=jnp.float32,
        minval=-bound, maxval=bound)

    ref = arc_margin_ref(x, weight)

    # Exact-semantics check: f32 MXU path.
    loss_f32 = jax.block_until_ready(
        arc_margin_forward(x, weight, mxu_dtype=jnp.float32))
    assert jnp.allclose(loss_f32, ref, rtol=1e-3, atol=1e-3), (loss_f32, ref)

    # Fast path (default): bf16 MXU inputs with f32 accumulation.
    loss_bf16 = jax.block_until_ready(arc_margin_forward(x, weight))
    assert jnp.allclose(loss_bf16, ref, rtol=5e-2, atol=5e-2), (loss_bf16, ref)

    print("KERNEL_OK")
</pallas_src>

<mosaic_0001>
module attributes {stable_mosaic.version = 11 : i64} {
  func.func @_normalize_rows_kernel(%arg0: i32, %arg1: memref<8x128xf32, #tpu.memory_space<vmem>>, %arg2: memref<8x128xf32, #tpu.memory_space<vmem>>) attributes {dimension_semantics = [#tpu.dimension_semantics<parallel>], iteration_bounds = array<i64: 2>, scalar_prefetch = 0 : i64, scratch_operands = 0 : i64, tpu.core_type = #tpu.core_type<tc>, window_params = [{transform_indices = @transform_0, window_bounds = array<i64: 8, 128>}, {transform_indices = @transform_1, window_bounds = array<i64: 8, 128>}]} {
    %c0 = arith.constant 0 : index
    %c0_0 = arith.constant 0 : index
    %0 = vector.load %arg1[%c0, %c0_0] : memref<8x128xf32, #tpu.memory_space<vmem>>, vector<8x128xf32>
    %1 = arith.mulf %0, %0 : vector<8x128xf32>
    %cst = arith.constant dense<0.000000e+00> : vector<8xf32>
    %2 = vector.multi_reduction <add>, %1, %cst [1] : vector<8x128xf32> to vector<8xf32>
    %3 = vector.shape_cast %2 : vector<8xf32> to vector<8x1xf32>
    %cst_1 = arith.constant 1.000000e-24 : f32
    %4 = vector.broadcast %cst_1 : f32 to vector<8x1xf32>
    %5 = arith.maximumf %3, %4 : vector<8x1xf32>
    %6 = math.rsqrt %5 : vector<8x1xf32>
    %7 = vector.broadcast %6 : vector<8x1xf32> to vector<8x128xf32>
    %8 = arith.mulf %0, %7 : vector<8x128xf32>
    %c0_2 = arith.constant 0 : index
    %c0_3 = arith.constant 0 : index
    %9 = vector.load %arg2[%c0_2, %c0_3] : memref<8x128xf32, #tpu.memory_space<vmem>>, vector<8x128xf32>
    tpu.vector_store %arg2[%c0_2, %c0_3], %8 {strides = array<i32>} : memref<8x128xf32, #tpu.memory_space<vmem>>, vector<8x128xf32>,
    return
  }
  func.func @transform_0(%arg0: i32) -> (i32, i32) {
    %c0_i32 = arith.constant 0 : i32
    %c0_i32_0 = arith.constant 0 : i32
    return %arg0, %c0_i32 : i32, i32
  }
  func.func @transform_1(%arg0: i32) -> (i32, i32) {
    %c0_i32 = arith.constant 0 : i32
    %c0_i32_0 = arith.constant 0 : i32
    return %arg0, %c0_i32 : i32, i32
  }
}

</mosaic_0001>

<bundles_post_ra>
// kernel: tpu_custom_call.1
= control target key start
LH: loop header
LB: loop body
LE: loop exit
PB: predicated region body
PF: predicated region fallthrough
CT: control target
= control target key end

     0   :  { %6 = vsyncpa [#allocation3], 0  ;;  %s532_s0 = inlined_call_operand.hbm [shape: f32[16,128], index: 0, kind: input, shape index: {}]   ;;  %s533_s1 = inlined_call_operand.hbm [shape: f32[16,128], index: 1, kind: output, shape index: {}]  }
   0x1   :  { %8 = vsyncpa [#allocation3 + $0x1], 0 }
   0x2   :  { %9 = vsyncpa [#allocation4], 0 }
   0x3   :  { %11 = vsyncpa [#allocation4 + $0x1], 0  ;;  %s405_s6 = smov 0   ;;  %s407_s7 = smov 0  }
   0x4   :  { %s409_s8 = smov 0   ;;  %s411_s9 = smov 0  }
   0x5 LB: > { %s426_s10 = sadd.s32 4294967295, %s393_s9   ;;  %s237_s11 = sadd.s32 4294967294, %s393_s9   ;;  %s393_s9 = sphi %s411_s9, %s543_s9   ;;  %s389_s8 = sphi %s409_s8, %s542_s8   ;;  %s385_s7 = sphi %s407_s7, %s541_s7   ;;  %s381_s6 = sphi %s405_s6, %s540_s6  }
   0x6   : > { %s430_s12 = sadd.s32 1, %s393_s9   ;;  %s24_s13 = sadd.s32 1, %s389_s8 }
   0x7   : > { %s21_s14 = ssub.s32 %s393_s9, %s430_s12  ;;  %p31_p0 = scmp.ne.s32.totalorder %s389_s8, %s385_s7 }
   0x8   : > { %p22_p1 = scmp.eq.s32.totalorder %s21_s14, 0  ;;  %p32_p2 = scmp.eq.s32.totalorder %s393_s9, 0 }
   0x9   : > { %p37_p3 = scmp.ne.s32.totalorder %s385_s7, %s381_s6  ;;  %p38_p4 = scmp.eq.s32.totalorder %s426_s10, 0 }
   0xa   : > { %s442_s15 = scalar_select %p22_p1, %s389_s8, %s24_s13  }
   0xb   : > { %p444_p5 = por %p32_p2, %p31_p0  ;;  %p448_p6 = por %p38_p4, %p37_p3 }
   0xc   : > { %p61_p7 = scmp.eq.s32.totalorder %s426_s10, 1  ;;  %p67_p8 = scmp.eq.s32.totalorder %s237_s11, 1 }
   0xd   : > { %p261_p10 = scmp.lt.s32.totalorder %s393_s9, 2  ;;  %s87_s20 = sand.u32 1, %s389_s8  }
   0xe   : > { %p455_p11 = por %p61_p7, %p31_p0  ;;  %p459_p12 = por %p67_p8, %p37_p3 }
   0xf   : > { %s241_s21 = sshll.u32 %s393_s9, 3  ;;  %s240_s22 = sshll.u32 %s87_s20, 3 }
  0x10   : > { %s95_s25 = scalar_lea.hbm %s532_s0, %s241_s21  ;;  %s91_s27 = scalar_lea.vmem [#allocation2], %s240_s22 }
  0x11   : > { %s97_s26 = sshll.u32 %s95_s25, 4  ;;  %s99_s28 = sshll.u32 %s91_s27, 4  ;;  %s98_s26 = int_to_ptr.hbm [resolvable:$true] %s97_s26  ;;  %s100_s28 = int_to_ptr.vmem [resolvable:$true] %s99_s28 }
  0x12   : > { %p470_p13 = pnand %p261_p10, %p444_p5  ;;  %p242_p0 = scmp.ge.s32.totalorder %s393_s9, 1 }
  0x13   : > { %p104_p1 = scmp.lt.s32.totalorder %s393_s9, 3  ;;  %s88_s30 = scalar_lea.sflag [#allocation3], %s87_s20 }
  0x14   : > { %s297_s2 = sshra.s32 %s98_s26, 4  ;;  %p301_p3 = pneg %p470_p13  ;;  %s298_s2 = int_to_ptr.hbm [resolvable:$true] %s297_s2 }
  0x15   : > { %s299_s3 = scalar_lea.hbm %s298_s2, 8  ;;  %s304_s11 = scalar_lea.hbm %s532_s0, 16 }
  0x16   : > { %p300_p2 = scmp.ne.s32.totalorder %s298_s2, %s299_s3  ;;  %p305_p5 = scmp.lt.s32.totalorder %s298_s2, %s532_s0 }
  0x17   : > { %p306_p8 = scmp.lt.s32.totalorder %s304_s11, %s299_s3 }
  0x18   : > { %p302_p4 = pnand %p301_p3, %p300_p2 }
  0x19   : > { %p307_p10 = por %p306_p8, %p305_p5 }
  0x1a   : > { %p303_p7 = pneg %p302_p4 }
  0x1c   : > { %p308_p9 = pnand %p307_p10, %p303_p7 }
  0x1e   : > { %311 = shalt.err (!%p308_p9)
}
  0x1f   : > { %256 = dma.hbm_to_vmem [thread:$0]  (!%p470_p13), %s98_s26, 128, %s100_s28, %s88_s30  }
  0x20   : > { %p105_p2 = pnand %p242_p0, %p104_p1 }
  0x21   : > { %s491_s16 = sand.u32 (!%p105_p2), 1, %s385_s7  }
  0x22   : > { %108 = sbr.rel (%p105_p2) target bundleno = 184 (0xb8), region = 24  ;;  %s243_s20 = sshll.u32 (!%p105_p2), %s491_s16, 3 }
  0x23   : > { %s111_s21 = scalar_lea.sflag (!%p105_p2), [#allocation3], %s491_s16  ;;  %s114_s22 = scalar_lea.vmem (!%p105_p2), [#allocation2], %s243_s20 }
  0x27   : > { %372 = dma.done.wait (%p448_p6), %s111_s21, 128  }
  0x28   : > { %374 = vsyncadd (%p448_p6), %s111_s21, 4294967168  ;;  %v134_v0 = vld [vmem:[%s114_s22] sm:$0xff]  ;;  %s246_s23 = sshll.u32 %s426_s10, 3  ;;  %s133_s17 = scalar_lea.vmem [#allocation5], %s243_s20 }
  0x29   : > { %v135_v1 = vmul.f32 %v134_v0, %v134_v0  ;;  %s162_s26 = scalar_lea.hbm %s533_s1, %s246_s23  ;;  %s164_s27 = sshll.u32 %s133_s17, 4  ;;  %s165_s27 = int_to_ptr.vmem [resolvable:$true] %s164_s27 }
  0x2a   : > { %s166_s28 = sshll.u32 %s162_s26, 4  ;;  %s152_s10 = scalar_lea.sflag [#allocation4], %s491_s16  ;;  %s167_s28 = int_to_ptr.hbm [resolvable:$true] %s166_s28 }
  0x2b   : > { %136 = vadd.xlane.f32.xlu0 %v135_v1  ;;  %s341_s29 = sshra.s32 %s167_s28, 4  ;;  %s347_s4 = scalar_lea.hbm %s533_s1, 16  ;;  %s342_s29 = int_to_ptr.hbm [resolvable:$true] %s341_s29 }
  0x2c   : > { %s343_s30 = scalar_lea.hbm %s342_s29, 8  ;;  %p348_p0 = scmp.lt.s32.totalorder %s342_s29, %s533_s1 }
  0x2d   : > { %p344_p6 = scmp.ne.s32.totalorder %s342_s29, %s343_s30  ;;  %p349_p1 = scmp.lt.s32.totalorder %s347_s4, %s343_s30 }
  0x2f   : > { %p345_p9 = pnand %p344_p6, %p455_p11  ;;  %p350_p3 = por %p349_p1, %p348_p0 }
  0x31   : > { %p346_p13 = pneg %p345_p9 }
  0x33   : > { %p351_p4 = pnand %p350_p3, %p346_p13 }
  0x9e   : > { %v137_v2 = vpop.xlane.xlu0 %136 }
  0x9f   : > { %v138_v3 = vmax.f32 %v137_v2, 1e-24 }
  0xa1   : > { %295 = vrsqrt.f32 %v138_v3  ;;  %vm145_vm1 = vweird.f32 %v138_v3 }
  0xa7   : > { %v296_v4 = vpop.eup %295 }
  0xa8   : > { %v140_v5 = vmul.f32 %v296_v4, %v138_v3  ;;  %vm146_vm0 = vweird.f32 %v296_v4 }
  0xa9   : > { %vm147_vm2 = vmor %vm145_vm1, %vm146_vm0 }
  0xaa   : > { %v141_v6 = vmul.f32 %v296_v4, %v140_v5 }
  0xac   : > { %v142_v7 = vmul.f32 0.5, %v141_v6 }
  0xae   : > { %v143_v8 = vsub.f32 1.5, %v142_v7 }
  0xb0   : > { %v144_v9 = vmul.f32 %v296_v4, %v143_v8 }
  0xb2   : > { %v148_v10 = vsel %vm147_vm2, %v296_v4, %v144_v9 }
  0xb3   : > { %v149_v11 = vmul.f32 %v148_v10, %v134_v0 }
  0xb5   : > { %150 = vst [vmem:[%s133_s17] sm:$0xff] %v149_v11 }
  0xb6   : > { %354 = shalt.err (!%p351_p4)
}
  0xb7   : > { %251 = dma.vmem_to_hbm [thread:$0]  (%p455_p11), %s165_s27, 128, %s167_s28, %s152_s10  }
  0xb8 PF: > { %s178_s13 = sand.u32 1, %s381_s6   ;;  %p539_p7 = scmp.ge.s32.totalorder %s393_s9, 2 }
  0xb9   : > { %s179_s14 = scalar_lea.sflag [#allocation4], %s178_s13 }
  0xba   : > { %p258_p5 = pnand %p539_p7, %p459_p12 }
  0xbc   : > { %p259_p8 = pneg %p258_p5 }
  0xbe   : > { %376 = dma.done.wait (%p259_p8), %s179_s14, 128  }
  0xbf   : > { %378 = vsyncadd (%p259_p8), %s179_s14, 4294967168  ;;  %p14_p10 = scmp.ge.s32.totalorder %s430_s12, 4   ;;  %s540_s6 = smov %s385_s7 }
  0xc0   : > { %s541_s7 = smov %s389_s8  ;;  %s542_s8 = smov %s442_s15 }
  0xc1   : > { %s543_s9 = smov %s430_s12  ;;  %16 = sbr.rel (!%p14_p10) target bundleno = 5 (0x5), region = 69 }
  0xc6   :  { %185 = vsyncpa [#allocation3], 1 }
  0xc7   :  { %187 = vsyncpa [#allocation3 + $0x1], 1 }
  0xc8   :  { %188 = vsyncpa [#allocation4], 1 }
  0xc9   :  { %190 = vsyncpa [#allocation4 + $0x1], 1 }

</bundles_post_ra>
